<compile_context>
chip_gen: v6e
topology: v6e:2x2x1
jax: 0.10.0
libtpu: 0.0.40
codegen_flags: <defaults>
</compile_context>

<pallas_src>
import functools

import jax
import jax.numpy as jnp
from jax.experimental import pallas as pl
from jax.experimental.pallas import tpu as pltpu

_SMEM = pltpu.MemorySpace.SMEM
_LANES = 128


def _gan_mse_kernel(label_ref, x_ref, o_ref, *, inv_count):
    # label_ref: (1,1) SMEM target label scalar
    # x_ref:     (block_rows, 128) VMEM block of the flattened prediction
    # o_ref:     (1,1) SMEM output, resident across the grid (accumulator)
    step = pl.program_id(0)

    @pl.when(step == 0)
    def _():
        o_ref[0, 0] = 0.0

    d = x_ref[...] - label_ref[0, 0]
    o_ref[0, 0] += jnp.sum(d * d)

    @pl.when(step == pl.num_programs(0) - 1)
    def _():
        o_ref[0, 0] = o_ref[0, 0] * inv_count   # mean = sum / true_count


def gan_loss(prediction, is_target_real, real_label=1.0, fake_label=0.0,
             block_rows=512):
    """MSE(prediction, label.expand_as(prediction)) as one fused Pallas call."""
    label_val = float(real_label) if is_target_real else float(fake_label)
    label = jnp.full((1, 1), label_val, jnp.float32)

    flat = prediction.reshape(-1).astype(jnp.float32)
    count = flat.size                              # true element count (divisor)

    rows = pl.cdiv(count, _LANES)
    br = min(block_rows, rows)                     # rows per grid step
    rows_padded = pl.cdiv(rows, br) * br
    pad = rows_padded * _LANES - count
    if pad:
        # Pad with the label value so padded elements contribute zero error.
        flat = jnp.concatenate([flat, jnp.full((pad,), label_val, jnp.float32)])
    x2d = flat.reshape(rows_padded, _LANES)        # lane-dense (rows, 128) view

    out = pl.pallas_call(
        functools.partial(_gan_mse_kernel, inv_count=1.0 / count),
        out_shape=jax.ShapeDtypeStruct((1, 1), jnp.float32),
        grid=(rows_padded // br,),
        in_specs=[
            pl.BlockSpec(memory_space=_SMEM),              # label scalar
            pl.BlockSpec((br, _LANES), lambda i: (i, 0)),  # prediction block
        ],
        out_specs=pl.BlockSpec(memory_space=_SMEM),        # resident (1,1) acc
        compiler_params=pltpu.CompilerParams(
            # Single grid axis is the reduction axis -> must stay "arbitrary".
            dimension_semantics=("arbitrary",)),
    )(label, x2d)
    return out[0, 0]


if __name__ == "__main__":
    key = jax.random.PRNGKey(0)
    prediction = jax.random.normal(key, (2, 4, 16, 16), jnp.float32)

    loss_real = gan_loss(prediction, True)    # target = real_label = 1.0
    loss_fake = gan_loss(prediction, False)   # target = fake_label = 0.0
    jax.block_until_ready((loss_real, loss_fake))

    ref_real = jnp.mean((prediction - 1.0) ** 2)
    ref_fake = jnp.mean(prediction ** 2)
    assert loss_real.shape == () and loss_fake.shape == ()
    assert jnp.isfinite(loss_real) and jnp.isfinite(loss_fake)
    assert jnp.allclose(loss_real, ref_real, rtol=1e-5, atol=1e-5)
    assert jnp.allclose(loss_fake, ref_fake, rtol=1e-5, atol=1e-5)
    print("KERNEL_OK")
</pallas_src>

<mosaic_0001>
module attributes {stable_mosaic.version = 11 : i64} {
  func.func @_gan_mse_kernel(%arg0: i32, %arg1: memref<1x1xf32, #tpu.memory_space<smem>>, %arg2: memref<16x128xf32, #tpu.memory_space<vmem>>, %arg3: memref<1x1xf32, #tpu.memory_space<smem>>) attributes {dimension_semantics = [#tpu.dimension_semantics<arbitrary>], iteration_bounds = array<i64: 1>, scalar_prefetch = 0 : i64, scratch_operands = 0 : i64, tpu.core_type = #tpu.core_type<tc>, window_params = [{transform_indices = @transform_0, window_bounds = array<i64: 1, 1>}, {transform_indices = @transform_1, window_bounds = array<i64: 16, 128>}, {transform_indices = @transform_2, window_bounds = array<i64: 1, 1>}]} {
    %c0_i32 = arith.constant 0 : i32
    %0 = arith.cmpi eq, %arg0, %c0_i32 : i32
    %1 = arith.extui %0 : i1 to i32
    %c0_i32_0 = arith.constant 0 : i32
    %2 = arith.cmpi ne, %1, %c0_i32_0 : i32
    scf.if %2 {
      %cst_10 = arith.constant 0.000000e+00 : f32
      %c0_11 = arith.constant 0 : index
      %c0_12 = arith.constant 0 : index
      %18 = memref.load %arg3[%c0_11, %c0_12] : memref<1x1xf32, #tpu.memory_space<smem>>
      memref.store %cst_10, %arg3[%c0_11, %c0_12] : memref<1x1xf32, #tpu.memory_space<smem>>
    } else {
    }
    %c0 = arith.constant 0 : index
    %c0_1 = arith.constant 0 : index
    %3 = vector.load %arg2[%c0, %c0_1] : memref<16x128xf32, #tpu.memory_space<vmem>>, vector<16x128xf32>
    %c0_2 = arith.constant 0 : index
    %c0_3 = arith.constant 0 : index
    %4 = memref.load %arg1[%c0_2, %c0_3] : memref<1x1xf32, #tpu.memory_space<smem>>
    %5 = vector.broadcast %4 : f32 to vector<16x128xf32>
    %6 = arith.subf %3, %5 : vector<16x128xf32>
    %c0_4 = arith.constant 0 : index
    %c0_5 = arith.constant 0 : index
    %7 = memref.load %arg3[%c0_4, %c0_5] : memref<1x1xf32, #tpu.memory_space<smem>>
    %8 = arith.mulf %6, %6 : vector<16x128xf32>
    %9 = vector.shape_cast %8 : vector<16x128xf32> to vector<1x16x128xf32>
    %cst = arith.constant dense<0.000000e+00> : vector<1xf32>
    %10 = vector.multi_reduction <add>, %9, %cst [1, 2] : vector<1x16x128xf32> to vector<1xf32>
    %11 = vector.shape_cast %10 : vector<1xf32> to vector<1x1x1xf32>
    %12 = vector.extract %11[0, 0, 0] : f32 from vector<1x1x1xf32>
    %13 = arith.addf %7, %12 : f32
    %c0_6 = arith.constant 0 : index
    %c0_7 = arith.constant 0 : index
    %14 = memref.load %arg3[%c0_6, %c0_7] : memref<1x1xf32, #tpu.memory_space<smem>>
    memref.store %13, %arg3[%c0_6, %c0_7] : memref<1x1xf32, #tpu.memory_space<smem>>
    %c0_i32_8 = arith.constant 0 : i32
    %15 = arith.cmpi eq, %arg0, %c0_i32_8 : i32
    %16 = arith.extui %15 : i1 to i32
    %c0_i32_9 = arith.constant 0 : i32
    %17 = arith.cmpi ne, %16, %c0_i32_9 : i32
    scf.if %17 {
      %c0_10 = arith.constant 0 : index
      %c0_11 = arith.constant 0 : index
      %18 = memref.load %arg3[%c0_10, %c0_11] : memref<1x1xf32, #tpu.memory_space<smem>>
      %cst_12 = arith.constant 4.8828125E-4 : f32
      %19 = arith.mulf %18, %cst_12 : f32
      %c0_13 = arith.constant 0 : index
      %c0_14 = arith.constant 0 : index
      %20 = memref.load %arg3[%c0_13, %c0_14] : memref<1x1xf32, #tpu.memory_space<smem>>
      memref.store %19, %arg3[%c0_13, %c0_14] : memref<1x1xf32, #tpu.memory_space<smem>>
    } else {
    }
    return
  }
  func.func @transform_0(%arg0: i32) -> (i32, i32) {
    %c0_i32 = arith.constant 0 : i32
    %c0_i32_0 = arith.constant 0 : i32
    %c0_i32_1 = arith.constant 0 : i32
    return %c0_i32, %c0_i32_0 : i32, i32
  }
  func.func @transform_1(%arg0: i32) -> (i32, i32) {
    %c0_i32 = arith.constant 0 : i32
    %c0_i32_0 = arith.constant 0 : i32
    return %arg0, %c0_i32 : i32, i32
  }
  func.func @transform_2(%arg0: i32) -> (i32, i32) {
    %c0_i32 = arith.constant 0 : i32
    %c0_i32_0 = arith.constant 0 : i32
    %c0_i32_1 = arith.constant 0 : i32
    return %c0_i32, %c0_i32_0 : i32, i32
  }
}

</mosaic_0001>

<bundles_post_ra>
// kernel: tpu_custom_call.1
= control target key start
LH: loop header
LB: loop body
LE: loop exit
PB: predicated region body
PF: predicated region fallthrough
CT: control target
= control target key end

     0   :  { %8 = vsyncpa [#allocation4], 0  ;;  %s142_s0 = inlined_call_operand.<no memory space> [shape: f32[1,1], index: 0, kind: input, shape index: {}]   ;;  %s143_s1 = inlined_call_operand.hbm [shape: f32[16,128], index: 1, kind: input, shape index: {}]   ;;  %s144_s2 = inlined_call_operand.hbm [shape: f32[1,1], index: 2, kind: output, shape index: {}]  }
   0x1   :  { %9 = vsyncpa [#allocation5], 0  ;;  %s114_s9 = smov [#allocation3]  }
   0x2   :  { %s17_s10 = sshll.u32 %s114_s9, 4  ;;  %s18_s10 = int_to_ptr.vmem [resolvable:$true] %s17_s10 }
   0x3   :  { %s90_s11 = scalar_lea.vmem %s18_s10, 256  ;;  %p95_p1 = scmp.lt.s32.totalorder %s18_s10, %s18_s10 }
   0x4   :  { %p91_p0 = scmp.ne.s32.totalorder %s18_s10, %s90_s11  ;;  %p96_p2 = scmp.lt.s32.totalorder %s90_s11, %s90_s11 }
   0x6   :  { %p97_p3 = por %p96_p2, %p95_p1 }
   0x8   :  { %p98_p4 = pnand %p97_p3, %p91_p0 }
   0xa   :  { %101 = shalt.err (!%p98_p4)
}
   0xb   :  { %s115_s12 = smov 128   ;;  %s116_s13 = smov 8  }
   0xc   :  { %23 = dma.hbm_to_vmem [thread:$0]  %s143_s1, 256, %s18_s10, [#allocation4], %s115_s12, %s115_s12, %s116_s13  }
   0xd   :  { %110 = dma.done.wait [#allocation4], 256  }
   0xe   :  { %111 = vsyncadd [#allocation4], 4294967040  ;;  %v36_v0 = vstv %s142_s0  ;;  %v33_v1 = vld [vmem:[#allocation3] sm:$0xff]  ;;  %v34_v2 = vld [vmem:[#allocation3 + $0x8] sm:$0xff]  ;;  %s117_s0 = smov [#allocation6]  }
   0xf   :  { %v37_v3 = vsub.f32 %v33_v1, %v36_v0  ;;  %v38_v4 = vsub.f32 %v34_v2, %v36_v0 }
  0x11   :  { %v40_v5 = vmul.f32 %v37_v3, %v37_v3  ;;  %v41_v6 = vmul.f32 %v38_v4, %v38_v4 }
  0x13   :  { %v42_v7 = vadd.f32 %v41_v6, %v40_v5 }
  0x15   :  { %43 = vadd.xlane.f32.xlu0 %v42_v7 }
  0x9e   :  { %v44_v8 = vpop.xlane.xlu0 %43 }
  0x9f   :  { %v45_v9 = vrot.slane %v44_v8, 4 }
  0xa1   :  { %v46_v10 = vadd.f32 %v45_v9, %v44_v8 }
  0xa3   :  { %v47_v11 = vrot.slane %v46_v10, 2 }
  0xa5   :  { %v48_v12 = vadd.f32 %v47_v11, %v46_v10 }
  0xa7   :  { %v49_v13 = vrot.slane %v48_v12, 1 }
  0xa9   :  { %v50_v14 = vadd.f32 %v49_v13, %v48_v12 }
  0xab   :  { %75 = vpush %v50_v14 }
  0xdc   :  { %s76_s1 = spop %75 }
  0xdd   :  { %s59_s18 = smul.f32 0.00048828125, %s76_s1 }
  0xdf   :  { %60 = sst [smem:[#allocation6]] %s59_s18 }
  0xe0   :  { %68 = dma.smem_to_hbm %s117_s0, 16, %s144_s2, [#allocation5]  }
  0xe1   :  { %112 = dma.done.wait [#allocation5], 16  }
  0xe2   :  { %113 = vsyncadd [#allocation5], 4294967280 }
  0xe3   :  { %72 = sfence }
  0xe4   :  { %73 = vsyncpa [#allocation4], 1 }
  0xe5   :  { %74 = vsyncpa [#allocation5], 1 }

</bundles_post_ra>
